<compile_context>
chip_gen: v5e
topology: v5e:2x2
jax: 0.10.0
libtpu: 0.0.40
codegen_flags: <defaults>
</compile_context>

<pallas_src>
import functools

import jax
import jax.numpy as jnp
from jax.experimental import pallas as pl
from jax.experimental.pallas import tpu as pltpu


def _round_up(v, m):
    return ((v + m - 1) // m) * m


def _linear_kernel_single_k(x_ref, w_ref, b_ref, o_ref):
    # x: (tm, dim), w: (dim, n_pad) pre-transposed, b: (1, n_pad) f32, o: (tm, n_pad).
    # Single MXU pass, f32 accumulate, fused bias add, lane-dense store. No scratch.
    o_ref[...] = (
        jnp.dot(x_ref[...], w_ref[...], preferred_element_type=jnp.float32)
        + b_ref[...]
    ).astype(o_ref.dtype)


def _linear_kernel_k_tiled(x_ref, w_ref, b_ref, o_ref, acc_ref):
    # Only used when the weight is too large to keep VMEM-resident in one piece.
    k = pl.program_id(1)

    @pl.when(k == 0)
    def _():
        # Initialize the accumulator with the broadcast bias: the bias add then
        # costs nothing extra at finalize.
        acc_ref[...] = jnp.broadcast_to(b_ref[...], acc_ref.shape)

    acc_ref[...] += jnp.dot(x_ref[...], w_ref[...],
                            preferred_element_type=jnp.float32)

    @pl.when(k == pl.num_programs(1) - 1)
    def _():
        o_ref[...] = acc_ref[...].astype(o_ref.dtype)


def _tpu_vmem_capacity_bytes():
    try:
        return int(pltpu.get_tpu_info().vmem_capacity_bytes)
    except Exception:
        # Conservative fallback (sized for v7x's 64 MiB per-TC VMEM; safe everywhere).
        return 64 * 1024 * 1024


def classifier_forward(x, weight, bias, *, tm=None, force_pallas=False,
                       compute_dtype=None):
    """y = x @ weight.T + bias   (matches torch.nn.Linear semantics).

    x: (n, dim), weight: (n_way, dim), bias: (n_way,).
    """
    n, dim = x.shape
    n_way, dim_w = weight.shape
    assert dim == dim_w and bias.shape == (n_way,)

    out_dtype = x.dtype                         # output dtype matches the input
    if compute_dtype is not None:               # optional bf16 streaming (v6e/v7x)
        x = x.astype(compute_dtype)

    n_pad = _round_up(n_way, 128)               # lane-dense output width (full vst)

    bpe_x = jnp.dtype(x.dtype).itemsize
    bpe_o = jnp.dtype(out_dtype).itemsize

    # Bytes-based tiny-problem fallback: below ~2 MiB of traffic the fixed
    # custom-call + pipeline cost dominates; let XLA fuse it.
    total_bytes = n * dim * bpe_x + dim * n_pad * bpe_x + n * n_pad * bpe_o
    if not force_pallas and total_bytes < (2 << 20):
        return (x @ weight.astype(x.dtype).T + bias).astype(out_dtype)

    # ---- one-time layout plumbing (keep the whole wrapper under jit so XLA
    # hoists/fuses the transpose + pad rather than re-materializing per call) ----
    w_t = jnp.pad(weight.astype(x.dtype).T, ((0, 0), (0, n_pad - n_way)))
    b_pad = jnp.pad(bias.astype(jnp.float32), (0, n_pad - n_way)).reshape(1, n_pad)
    bpe_w = jnp.dtype(w_t.dtype).itemsize

    # ---- per-generation VMEM budget / limit ----
    vmem_cap = _tpu_vmem_capacity_bytes()
    vmem_budget = min(int(vmem_cap * 0.45), 96 * 1024 * 1024)
    vmem_limit = int(min(vmem_budget + (8 << 20), int(vmem_cap * 0.6)))

    # ---- K tiling only when the double-buffered weight would eat a big chunk
    # of the budget; otherwise the whole (dim, n_pad) weight stays resident
    # (constant index_map => fetched once, no per-row-tile re-DMA). ----
    tk = dim
    if 2 * dim * n_pad * bpe_w > vmem_budget // 3:
        for cand in (1024, 512, 256, 128):
            if dim % cand == 0:
                tk = cand
                break
    k_tiled = tk != dim
    grid_k = dim // tk

    # ---- row tile sized against the budget ----
    sub = 16 if bpe_x == 2 else 8               # sublane packing (bf16 packs 2x)
    if tm is None:
        fixed = 2 * tk * n_pad * bpe_w + 2 * n_pad * 4        # weight + bias buffers
        per_row = 2 * tk * bpe_x + 2 * n_pad * bpe_o          # x dbl-buf + out dbl-buf
        if k_tiled:
            per_row += n_pad * 4                              # f32 accumulator scratch
        tm = max(sub, (vmem_budget - fixed) // max(per_row, 1))
        tm = int(min(tm, 4096))
        if tm >= n:
            tm = n
            # Keep >= 2 row tiles when the batch allows it so the "parallel" axis
            # can shard across v7x's 2 TensorCores; negligible cost on 1-TC parts.
            if n >= 2 * sub:
                tm = _round_up(pl.cdiv(n, 2), sub)
        else:
            tm = (tm // sub) * sub
    grid_m = pl.cdiv(n, tm)

    common_kwargs = dict(
        out_shape=jax.ShapeDtypeStruct((n, n_pad), out_dtype),
        compiler_params=pltpu.CompilerParams(
            dimension_semantics=(("parallel", "arbitrary") if k_tiled
                                 else ("parallel",)),
            vmem_limit_bytes=vmem_limit,
        ),
    )

    if not k_tiled:
        y_pad = pl.pallas_call(
            _linear_kernel_single_k,
            grid_spec=pltpu.PrefetchScalarGridSpec(
                num_scalar_prefetch=0,
                grid=(grid_m,),
                in_specs=[
                    pl.BlockSpec((tm, dim), lambda i: (i, 0)),      # x rows (stream)
                    pl.BlockSpec((dim, n_pad), lambda i: (0, 0)),   # weight (resident)
                    pl.BlockSpec((1, n_pad), lambda i: (0, 0)),     # bias (resident)
                ],
                out_specs=pl.BlockSpec((tm, n_pad), lambda i: (i, 0)),
            ),
            **common_kwargs,
        )(x, w_t, b_pad)
    else:
        y_pad = pl.pallas_call(
            _linear_kernel_k_tiled,
            grid_spec=pltpu.PrefetchScalarGridSpec(
                num_scalar_prefetch=0,
                grid=(grid_m, grid_k),
                in_specs=[
                    pl.BlockSpec((tm, tk), lambda i, k: (i, k)),
                    pl.BlockSpec((tk, n_pad), lambda i, k: (k, 0)),
                    pl.BlockSpec((1, n_pad), lambda i, k: (0, 0)),
                ],
                out_specs=pl.BlockSpec((tm, n_pad), lambda i, k: (i, 0)),
                scratch_shapes=[pltpu.VMEM((tm, n_pad), jnp.float32)],
            ),
            **common_kwargs,
        )(x, w_t, b_pad)

    # TODO(synk): downstream masked softmax/argmax could consume the padded
    # (n, n_pad) logits directly and skip this extra copy.
    return y_pad[:, :n_way]


if __name__ == "__main__":
    # Deterministic synthetic parameters / inputs (no checkpoint loading).
    batch, dim, n_way = 8, 32, 5

    key = jax.random.PRNGKey(0)
    kx, kw, kb = jax.random.split(key, 3)

    x = jax.random.normal(kx, (batch, dim), dtype=jnp.float32)
    # nn.Linear default init ~ U(-1/sqrt(dim), 1/sqrt(dim)); deterministic analog.
    bound = 1.0 / (dim ** 0.5)
    weight = jax.random.uniform(kw, (n_way, dim), minval=-bound, maxval=bound,
                                dtype=jnp.float32)
    bias = jax.random.uniform(kb, (n_way,), minval=-bound, maxval=bound,
                              dtype=jnp.float32)

    # Force the Pallas path so the kernel is exercised even at this tiny size;
    # jit the whole wrapper so the weight transpose/pad is hoisted by XLA.
    fwd = jax.jit(functools.partial(classifier_forward, force_pallas=True))
    y = fwd(x, weight, bias)
    jax.block_until_ready(y)

    # Cross-check against plain JAX reference of the same math.
    y_ref = x @ weight.T + bias
    assert y.shape == (batch, n_way)
    assert jnp.allclose(y, y_ref, atol=1e-5, rtol=1e-5)

    print("KERNEL_OK")
</pallas_src>

<mosaic_0001>
module attributes {stable_mosaic.version = 11 : i64} {
  func.func @_linear_kernel_single_k(%arg0: i32, %arg1: memref<8x32xf32, #tpu.memory_space<vmem>>, %arg2: memref<32x128xf32, #tpu.memory_space<vmem>>, %arg3: memref<1x128xf32, #tpu.memory_space<vmem>>, %arg4: memref<8x128xf32, #tpu.memory_space<vmem>>) attributes {dimension_semantics = [#tpu.dimension_semantics<parallel>], iteration_bounds = array<i64: 1>, scalar_prefetch = 0 : i64, scratch_operands = 0 : i64, tpu.core_type = #tpu.core_type<tc>, window_params = [{transform_indices = @transform_0, window_bounds = array<i64: 8, 32>}, {pipeline_mode = #tpu.pipeline_mode<synchronous>, transform_indices = @transform_1, window_bounds = array<i64: 32, 128>}, {pipeline_mode = #tpu.pipeline_mode<synchronous>, transform_indices = @transform_2, window_bounds = array<i64: 1, 128>}, {transform_indices = @transform_3, window_bounds = array<i64: 8, 128>}]} {
    %c0 = arith.constant 0 : index
    %c0_0 = arith.constant 0 : index
    %0 = vector.load %arg1[%c0, %c0_0] : memref<8x32xf32, #tpu.memory_space<vmem>>, vector<8x32xf32>
    %c0_1 = arith.constant 0 : index
    %c0_2 = arith.constant 0 : index
    %1 = vector.load %arg2[%c0_1, %c0_2] : memref<32x128xf32, #tpu.memory_space<vmem>>, vector<32x128xf32>
    %cst = arith.constant dense<0.000000e+00> : vector<8x128xf32>
    %2 = tpu.matmul %0, %1, %cst {dimension_numbers = #tpu.dot_dimension_numbers<[1], [0], [0], [1], [0, 0, 1, 1], [], []>} : vector<8x32xf32>, vector<32x128xf32>, vector<8x128xf32> -> vector<8x128xf32>
    %c0_3 = arith.constant 0 : index
    %c0_4 = arith.constant 0 : index
    %3 = vector.load %arg3[%c0_3, %c0_4] : memref<1x128xf32, #tpu.memory_space<vmem>>, vector<1x128xf32>
    %4 = vector.broadcast %3 : vector<1x128xf32> to vector<8x128xf32>
    %5 = arith.addf %2, %4 : vector<8x128xf32>
    %c0_5 = arith.constant 0 : index
    %c0_6 = arith.constant 0 : index
    %6 = vector.load %arg4[%c0_5, %c0_6] : memref<8x128xf32, #tpu.memory_space<vmem>>, vector<8x128xf32>
    tpu.vector_store %arg4[%c0_5, %c0_6], %5 {strides = array<i32>} : memref<8x128xf32, #tpu.memory_space<vmem>>, vector<8x128xf32>,
    return
  }
  func.func @transform_0(%arg0: i32) -> (i32, i32) {
    %c0_i32 = arith.constant 0 : i32
    %c0_i32_0 = arith.constant 0 : i32
    return %arg0, %c0_i32 : i32, i32
  }
  func.func @transform_1(%arg0: i32) -> (i32, i32) {
    %c0_i32 = arith.constant 0 : i32
    %c0_i32_0 = arith.constant 0 : i32
    %c0_i32_1 = arith.constant 0 : i32
    return %c0_i32, %c0_i32_0 : i32, i32
  }
  func.func @transform_2(%arg0: i32) -> (i32, i32) {
    %c0_i32 = arith.constant 0 : i32
    %c0_i32_0 = arith.constant 0 : i32
    %c0_i32_1 = arith.constant 0 : i32
    return %c0_i32, %c0_i32_0 : i32, i32
  }
  func.func @transform_3(%arg0: i32) -> (i32, i32) {
    %c0_i32 = arith.constant 0 : i32
    %c0_i32_0 = arith.constant 0 : i32
    return %arg0, %c0_i32 : i32, i32
  }
}

</mosaic_0001>

<bundles_post_ra>
// kernel: classifier_forward.1
= control target key start
LH: loop header
LB: loop body
LE: loop exit
PB: predicated region body
PF: predicated region fallthrough
CT: control target
= control target key end

     0   :  { %s136_s0 = inlined_call_operand.vmem [shape: f32[8,32], index: 0, kind: input, shape index: {}]   ;;  %s137_s1 = inlined_call_operand.vmem [shape: f32[32,128], index: 1, kind: input, shape index: {}]   ;;  %s138_s2 = inlined_call_operand.vmem [shape: f32[1,128], index: 2, kind: input, shape index: {}]   ;;  %s139_s3 = inlined_call_operand.hbm [shape: f32[8,128], index: 3, kind: output, shape index: {}]  }
   0x1   :  { %v19_v0 = vld [vmem:[%s137_s1 + $0x18] sm:$0xff]  ;;  %v18_v1 = vld [vmem:[%s137_s1 + $0x10] sm:$0xff]  ;;  %v17_v2 = vld [vmem:[%s137_s1 + $0x8] sm:$0xff] }
   0x2   :  { %40 = vmatpush.msra.mxu0 %v19_v0 }
   0x3   :  { %8 = vsyncpa [#allocation3], 0  ;;  %v16_v3 = vld [vmem:[%s137_s1] sm:$0xff]  ;;  %vm24_vm0 = vcmask 261120   ;;  %s94_s24 = smov [#allocation2]   ;;  %s56_s28 = sshll.u32 %s139_s3, 4  ;;  %s57_s28 = int_to_ptr.hbm [resolvable:$true] %s56_s28 }
   0x4   :  { %41 = vmatpush.msra.mxu0 %v18_v1  ;;  %v15_v4 = vld [vmem:[%s136_s0] sm:$0xff]  ;;  %s54_s25 = sshll.u32 %s94_s24, 4  ;;  %s55_s25 = int_to_ptr.vmem [resolvable:$true] %s54_s25 }
   0x5   :  { %v67_v5 = vld [vmem:[%s138_s2] ss:$0 sm:$0xff] }
   0x6   :  { %42 = vmatpush.msra.mxu0 %v17_v2 }
   0x8   :  { %43 = vmatpush.msra.mxu0 %v16_v3 }
   0x9   :  { %65 = vmatmul.msk.f32.vlgmr.msra.gmra.mxu0 %vm24_vm0, %v15_v4 }
  0x86   :  { %v45_v6 = vpop.f32.mrf.mxu0 }
  0x87   :  { %v46_v7 = vadd.f32 %v67_v5, %v45_v6 }
  0x89   :  { %48 = vst [vmem:[#allocation2] sm:$0xff] %v46_v7 }
  0x8a   :  { %59 = dma.vmem_to_hbm [thread:$0]  %s55_s25, 128, %s57_s28, [#allocation3]  }
  0x8b   :  { %92 = dma.done.wait [#allocation3], 128  }
  0x8c   :  { %93 = vsyncadd [#allocation3], 4294967168 }
  0x8d   :  { %64 = vsyncpa [#allocation3], 1 }

</bundles_post_ra>
